<compile_context>
chip_gen: v6e
topology: v6e:2x2x1
jax: 0.10.0
libtpu: 0.0.40
codegen_flags: <defaults>
</compile_context>

<pallas_src>
import jax
import jax.numpy as jnp
from jax.experimental import pallas as pl
from jax.experimental.pallas import tpu as pltpu

# ---- small, forward-consistent shapes ---------------------------------------
B, C, H, W = 2, 3, 16, 16          # images: [2, 3, 16, 16] (NCHW)
KH = KW = 3
DIM_MLP = 128                      # encoder feature width (dim_mlp)
DIM = 64                           # projection dim
NUM_CLASSES = 10
HW = H * W
KPATCH = C * KH * KW               # 27
KP_PAD = 32                        # K padded to 32 (col 27 = 1.0 bias col, 28..31 = 0)
FUSED_W = 2 * DIM_MLP              # 256 = [w1 (128) | wc padded to 128]
POOL_CHUNK = 128                   # conv rows reduced per step (<= 16 live vregs)
OUT_ROWS = 8                       # one full (8,128) vreg output slab


# ----------------------------- fused Pallas kernel ---------------------------
def _protocon_kernel(p_ref, wconv_ref, w1c_ref, b1c_ref, w2_ref, b2_ref, out_ref):
    # ---- encoder: chunked (matmul -> ReLU -> row-sum) ------------------------
    # p_ref: (B*HW, 32)  (col 27 == 1.0);  wconv_ref: (32, 128) (row 27 == b_conv)
    wconv = wconv_ref[...]
    feat_rows = []
    for b in range(B):
        acc = jnp.zeros((1, DIM_MLP), jnp.float32)
        for ck in range(HW // POOL_CHUNK):
            r0 = b * HW + ck * POOL_CHUNK
            y = jnp.dot(p_ref[r0:r0 + POOL_CHUNK, :], wconv,
                        preferred_element_type=jnp.float32)   # conv + bias (ones col)
            y = jnp.maximum(y, 0.0)                            # ReLU
            acc = acc + jnp.sum(y, axis=0, keepdims=True)      # partial sum-pool
        feat_rows.append(acc)                                  # (1, 128) per image
    feat_sum = jnp.concatenate(feat_rows, axis=0)              # (B, 128); 1/HW in w1c

    # ---- head: fused [projector-layer-1 | classifier] matmul -----------------
    # w1c_ref: (128, 256) = [w1 | wc | zero pad] * (1/HW);  b1c_ref: (1, 256)
    hz = jnp.dot(feat_sum, w1c_ref[...],
                 preferred_element_type=jnp.float32) + b1c_ref[...]
    h = hz[:, :DIM_MLP]                                        # (B, 128)
    preds = hz[:, DIM_MLP:]                                    # (B, 128) = [preds | 0]

    # projector: LeakyReLU(0.1) -> Linear (w2 zero-padded to 128 output cols)
    h = jnp.where(h >= 0.0, h, 0.1 * h)
    p = jnp.dot(h, w2_ref[...],
                preferred_element_type=jnp.float32) + b2_ref[...]   # (B, 128) = [p | 0]
    # F.normalize(dim=1): x / max(||x||_2, 1e-12); zero pad cols don't change the norm
    norm = jnp.sqrt(jnp.sum(p * p, axis=1, keepdims=True))
    projn = p / jnp.maximum(norm, 1e-12)                       # (B, 128) = [proj | 0]

    # single dense (8,128) slab: rows 0..B-1 = preds, B..2B-1 = proj, rest zero
    out_ref[...] = jnp.concatenate(
        [preds, projn, jnp.zeros((OUT_ROWS - 2 * B, DIM_MLP), jnp.float32)], axis=0)


# ------------------------------ JAX glue --------------------------------------
def _im2col(x):
    """x: [B, C, H, W] (NCHW) -> patches [B*HW, KP_PAD], 'same' padding.
    Column KPATCH (=27) is a constant 1.0 (bias column); 28..31 are zero."""
    xp = jnp.pad(x, ((0, 0), (0, 0), (1, 1), (1, 1)))
    cols = [xp[:, :, dh:dh + H, dw:dw + W] for dh in range(KH) for dw in range(KW)]
    patches = jnp.stack(cols, axis=2)                            # [B, C, 9, H, W]
    patches = patches.transpose(0, 3, 4, 1, 2).reshape(B * HW, KPATCH)
    ones = jnp.ones((B * HW, 1), patches.dtype)                  # bias column
    zeros = jnp.zeros((B * HW, KP_PAD - KPATCH - 1), patches.dtype)
    return jnp.concatenate([patches, ones, zeros], axis=1)       # [512, 32]


def pack_params(params):
    """One-time packing of weights for the fused kernel (outside the hot path)."""
    # conv weight with the bias folded in as K-row 27 (multiplies the ones column)
    w_conv = jnp.concatenate(
        [params["w_conv"],                                       # (27, 128)
         params["b_conv"],                                       # (1, 128)
         jnp.zeros((KP_PAD - KPATCH - 1, DIM_MLP), jnp.float32)], axis=0)   # (32, 128)
    # fuse projector layer 1 and classifier (same LHS = feat); fold 1/HW (mean pool)
    wc_pad = jnp.pad(params["wc"], ((0, 0), (0, DIM_MLP - NUM_CLASSES)))    # (128, 128)
    bc_pad = jnp.pad(params["bc"], ((0, 0), (0, DIM_MLP - NUM_CLASSES)))    # (1, 128)
    w1c = jnp.concatenate([params["w1"], wc_pad], axis=1) * (1.0 / HW)      # (128, 256)
    b1c = jnp.concatenate([params["b1"], bc_pad], axis=1)                   # (1, 256)
    # lane-dense second projector layer (pad output cols 64 -> 128 with zeros)
    w2 = jnp.pad(params["w2"], ((0, 0), (0, DIM_MLP - DIM)))                # (128, 128)
    b2 = jnp.pad(params["b2"], ((0, 0), (0, DIM_MLP - DIM)))                # (1, 128)
    return {"w_conv": w_conv, "w1c": w1c, "b1c": b1c, "w2": w2, "b2": b2}


def protocon_forward(images, packed):
    patches = _im2col(images)                                    # [B*HW, 32]
    vmem = pl.BlockSpec(memory_space=pltpu.MemorySpace.VMEM)
    out = pl.pallas_call(
        _protocon_kernel,
        out_shape=jax.ShapeDtypeStruct((OUT_ROWS, DIM_MLP), jnp.float32),
        in_specs=[vmem] * 6,
        out_specs=vmem,
    )(patches, packed["w_conv"], packed["w1c"], packed["b1c"],
      packed["w2"], packed["b2"])
    preds = out[:B, :NUM_CLASSES]
    proj = out[B:2 * B, :DIM]
    return preds, proj


def init_params(key):
    """Deterministic synthetic parameters (PyTorch Linear stores [out, in];
    we pre-transpose so kernels do x @ W)."""
    ks = jax.random.split(key, 8)
    s = 0.05
    w_conv = jax.random.normal(ks[0], (DIM_MLP, KPATCH), jnp.float32) * s   # [out, in*k*k]
    b_conv = jax.random.normal(ks[1], (DIM_MLP,), jnp.float32) * s
    w1 = jax.random.normal(ks[2], (DIM_MLP, DIM_MLP), jnp.float32) * s
    b1 = jax.random.normal(ks[3], (DIM_MLP,), jnp.float32) * s
    w2 = jax.random.normal(ks[4], (DIM, DIM_MLP), jnp.float32) * s
    b2 = jax.random.normal(ks[5], (DIM,), jnp.float32) * s
    wc = jax.random.normal(ks[6], (NUM_CLASSES, DIM_MLP), jnp.float32) * s
    bc = jax.random.normal(ks[7], (NUM_CLASSES,), jnp.float32) * s
    return {
        "w_conv": w_conv.T, "b_conv": b_conv.reshape(1, DIM_MLP),
        "w1": w1.T, "b1": b1.reshape(1, DIM_MLP),
        "w2": w2.T, "b2": b2.reshape(1, DIM),
        "wc": wc.T, "bc": bc.reshape(1, NUM_CLASSES),
    }


def _reference_forward(images, params):
    """Pure-JAX reference for correctness checking (unpadded params)."""
    patches = _im2col(images)[:, :KPATCH].reshape(B, HW, KPATCH)
    y = jnp.maximum(patches @ params["w_conv"] + params["b_conv"], 0.0)
    feat = jnp.mean(y, axis=1)                                   # [B, DIM_MLP]
    h = feat @ params["w1"] + params["b1"]
    h = jnp.where(h >= 0.0, h, 0.1 * h)
    p = h @ params["w2"] + params["b2"]
    p = p / jnp.maximum(jnp.sqrt(jnp.sum(p * p, axis=1, keepdims=True)), 1e-12)
    preds = feat @ params["wc"] + params["bc"]
    return preds, p


if __name__ == "__main__":
    key = jax.random.PRNGKey(0)
    k_img, k_par = jax.random.split(key)
    images = jax.random.normal(k_img, (B, C, H, W), jnp.float32)   # NCHW
    params = init_params(k_par)
    packed = pack_params(params)                                    # one-time packing

    fwd = jax.jit(protocon_forward)
    preds, proj = fwd(images, packed)
    jax.block_until_ready((preds, proj))

    preds_ref, proj_ref = _reference_forward(images, params)
    assert preds.shape == (B, NUM_CLASSES) and proj.shape == (B, DIM)
    assert jnp.allclose(preds, preds_ref, atol=1e-4, rtol=1e-4)
    assert jnp.allclose(proj, proj_ref, atol=1e-4, rtol=1e-4)
    # projections are unit-norm
    assert jnp.allclose(jnp.linalg.norm(proj, axis=1), 1.0, atol=1e-4)

    print("KERNEL_OK")
</pallas_src>

<mosaic_0001>
module attributes {stable_mosaic.version = 11 : i64} {
  func.func @_protocon_kernel(%arg0: memref<512x32xf32, #tpu.memory_space<vmem>>, %arg1: memref<32x128xf32, #tpu.memory_space<vmem>>, %arg2: memref<128x256xf32, #tpu.memory_space<vmem>>, %arg3: memref<1x256xf32, #tpu.memory_space<vmem>>, %arg4: memref<128x128xf32, #tpu.memory_space<vmem>>, %arg5: memref<1x128xf32, #tpu.memory_space<vmem>>, %arg6: memref<8x128xf32, #tpu.memory_space<vmem>>) attributes {dimension_semantics = [], scalar_prefetch = 0 : i64, scratch_operands = 0 : i64, tpu.core_type = #tpu.core_type<tc>} {
    %c0 = arith.constant 0 : index
    %c0_0 = arith.constant 0 : index
    %0 = vector.load %arg1[%c0, %c0_0] : memref<32x128xf32, #tpu.memory_space<vmem>>, vector<32x128xf32>
    %cst = arith.constant 0.000000e+00 : f32
    %1 = vector.broadcast %cst : f32 to vector<1x128xf32>
    %c0_1 = arith.constant 0 : index
    %c0_2 = arith.constant 0 : index
    %2 = vector.load %arg0[%c0_1, %c0_2] : memref<512x32xf32, #tpu.memory_space<vmem>>, vector<128x32xf32>
    %cst_3 = arith.constant dense<0.000000e+00> : vector<128x128xf32>
    %3 = tpu.matmul %2, %0, %cst_3 {dimension_numbers = #tpu.dot_dimension_numbers<[1], [0], [0], [1], [0, 0, 1, 1], [], []>} : vector<128x32xf32>, vector<32x128xf32>, vector<128x128xf32> -> vector<128x128xf32>
    %cst_4 = arith.constant 0.000000e+00 : f32
    %4 = vector.broadcast %cst_4 : f32 to vector<128x128xf32>
    %5 = arith.maximumf %3, %4 : vector<128x128xf32>
    %cst_5 = arith.constant dense<0.000000e+00> : vector<128xf32>
    %6 = vector.multi_reduction <add>, %5, %cst_5 [0] : vector<128x128xf32> to vector<128xf32>
    %7 = vector.shape_cast %6 : vector<128xf32> to vector<1x128xf32>
    %8 = arith.addf %1, %7 : vector<1x128xf32>
    %c128 = arith.constant 128 : index
    %c0_6 = arith.constant 0 : index
    %9 = vector.load %arg0[%c128, %c0_6] : memref<512x32xf32, #tpu.memory_space<vmem>>, vector<128x32xf32>
    %cst_7 = arith.constant dense<0.000000e+00> : vector<128x128xf32>
    %10 = tpu.matmul %9, %0, %cst_7 {dimension_numbers = #tpu.dot_dimension_numbers<[1], [0], [0], [1], [0, 0, 1, 1], [], []>} : vector<128x32xf32>, vector<32x128xf32>, vector<128x128xf32> -> vector<128x128xf32>
    %cst_8 = arith.constant 0.000000e+00 : f32
    %11 = vector.broadcast %cst_8 : f32 to vector<128x128xf32>
    %12 = arith.maximumf %10, %11 : vector<128x128xf32>
    %cst_9 = arith.constant dense<0.000000e+00> : vector<128xf32>
    %13 = vector.multi_reduction <add>, %12, %cst_9 [0] : vector<128x128xf32> to vector<128xf32>
    %14 = vector.shape_cast %13 : vector<128xf32> to vector<1x128xf32>
    %15 = arith.addf %8, %14 : vector<1x128xf32>
    %cst_10 = arith.constant 0.000000e+00 : f32
    %16 = vector.broadcast %cst_10 : f32 to vector<1x128xf32>
    %c256 = arith.constant 256 : index
    %c0_11 = arith.constant 0 : index
    %17 = vector.load %arg0[%c256, %c0_11] : memref<512x32xf32, #tpu.memory_space<vmem>>, vector<128x32xf32>
    %cst_12 = arith.constant dense<0.000000e+00> : vector<128x128xf32>
    %18 = tpu.matmul %17, %0, %cst_12 {dimension_numbers = #tpu.dot_dimension_numbers<[1], [0], [0], [1], [0, 0, 1, 1], [], []>} : vector<128x32xf32>, vector<32x128xf32>, vector<128x128xf32> -> vector<128x128xf32>
    %cst_13 = arith.constant 0.000000e+00 : f32
    %19 = vector.broadcast %cst_13 : f32 to vector<128x128xf32>
    %20 = arith.maximumf %18, %19 : vector<128x128xf32>
    %cst_14 = arith.constant dense<0.000000e+00> : vector<128xf32>
    %21 = vector.multi_reduction <add>, %20, %cst_14 [0] : vector<128x128xf32> to vector<128xf32>
    %22 = vector.shape_cast %21 : vector<128xf32> to vector<1x128xf32>
    %23 = arith.addf %16, %22 : vector<1x128xf32>
    %c384 = arith.constant 384 : index
    %c0_15 = arith.constant 0 : index
    %24 = vector.load %arg0[%c384, %c0_15] : memref<512x32xf32, #tpu.memory_space<vmem>>, vector<128x32xf32>
    %cst_16 = arith.constant dense<0.000000e+00> : vector<128x128xf32>
    %25 = tpu.matmul %24, %0, %cst_16 {dimension_numbers = #tpu.dot_dimension_numbers<[1], [0], [0], [1], [0, 0, 1, 1], [], []>} : vector<128x32xf32>, vector<32x128xf32>, vector<128x128xf32> -> vector<128x128xf32>
    %cst_17 = arith.constant 0.000000e+00 : f32
    %26 = vector.broadcast %cst_17 : f32 to vector<128x128xf32>
    %27 = arith.maximumf %25, %26 : vector<128x128xf32>
    %cst_18 = arith.constant dense<0.000000e+00> : vector<128xf32>
    %28 = vector.multi_reduction <add>, %27, %cst_18 [0] : vector<128x128xf32> to vector<128xf32>
    %29 = vector.shape_cast %28 : vector<128xf32> to vector<1x128xf32>
    %30 = arith.addf %23, %29 : vector<1x128xf32>
    %31 = tpu.concatenate %15, %30 in 0 : vector<1x128xf32>, vector<1x128xf32> -> vector<2x128xf32>
    %c0_19 = arith.constant 0 : index
    %c0_20 = arith.constant 0 : index
    %32 = vector.load %arg2[%c0_19, %c0_20] : memref<128x256xf32, #tpu.memory_space<vmem>>, vector<128x256xf32>
    %cst_21 = arith.constant dense<0.000000e+00> : vector<2x256xf32>
    %33 = tpu.matmul %31, %32, %cst_21 {dimension_numbers = #tpu.dot_dimension_numbers<[1], [0], [0], [1], [0, 0, 1, 1], [], []>} : vector<2x128xf32>, vector<128x256xf32>, vector<2x256xf32> -> vector<2x256xf32>
    %c0_22 = arith.constant 0 : index
    %c0_23 = arith.constant 0 : index
    %34 = vector.load %arg3[%c0_22, %c0_23] : memref<1x256xf32, #tpu.memory_space<vmem>>, vector<1x256xf32>
    %35 = vector.broadcast %34 : vector<1x256xf32> to vector<2x256xf32>
    %36 = arith.addf %33, %35 : vector<2x256xf32>
    %37 = vector.extract_strided_slice %36 {offsets = [0, 0], sizes = [2, 128], strides = [1, 1]} : vector<2x256xf32> to vector<2x128xf32>
    %38 = vector.extract_strided_slice %36 {offsets = [0, 128], sizes = [2, 128], strides = [1, 1]} : vector<2x256xf32> to vector<2x128xf32>
    %cst_24 = arith.constant 0.000000e+00 : f32
    %39 = vector.broadcast %cst_24 : f32 to vector<2x128xf32>
    %40 = arith.cmpf oge, %37, %39 : vector<2x128xf32>
    %cst_25 = arith.constant 1.000000e-01 : f32
    %41 = vector.broadcast %cst_25 : f32 to vector<2x128xf32>
    %42 = arith.mulf %41, %37 : vector<2x128xf32>
    %43 = arith.select %40, %37, %42 : vector<2x128xi1>, vector<2x128xf32>
    %c0_26 = arith.constant 0 : index
    %c0_27 = arith.constant 0 : index
    %44 = vector.load %arg4[%c0_26, %c0_27] : memref<128x128xf32, #tpu.memory_space<vmem>>, vector<128x128xf32>
    %cst_28 = arith.constant dense<0.000000e+00> : vector<2x128xf32>
    %45 = tpu.matmul %43, %44, %cst_28 {dimension_numbers = #tpu.dot_dimension_numbers<[1], [0], [0], [1], [0, 0, 1, 1], [], []>} : vector<2x128xf32>, vector<128x128xf32>, vector<2x128xf32> -> vector<2x128xf32>
    %c0_29 = arith.constant 0 : index
    %c0_30 = arith.constant 0 : index
    %46 = vector.load %arg5[%c0_29, %c0_30] : memref<1x128xf32, #tpu.memory_space<vmem>>, vector<1x128xf32>
    %47 = vector.broadcast %46 : vector<1x128xf32> to vector<2x128xf32>
    %48 = arith.addf %45, %47 : vector<2x128xf32>
    %49 = arith.mulf %48, %48 : vector<2x128xf32>
    %cst_31 = arith.constant dense<0.000000e+00> : vector<2xf32>
    %50 = vector.multi_reduction <add>, %49, %cst_31 [1] : vector<2x128xf32> to vector<2xf32>
    %51 = vector.shape_cast %50 : vector<2xf32> to vector<2x1xf32>
    %52 = math.sqrt %51 : vector<2x1xf32>
    %cst_32 = arith.constant 9.99999996E-13 : f32
    %53 = vector.broadcast %cst_32 : f32 to vector<2x1xf32>
    %54 = arith.maximumf %52, %53 : vector<2x1xf32>
    %55 = vector.broadcast %54 : vector<2x1xf32> to vector<2x128xf32>
    %56 = arith.divf %48, %55 : vector<2x128xf32>
    %cst_33 = arith.constant 0.000000e+00 : f32
    %57 = vector.broadcast %cst_33 : f32 to vector<4x128xf32>
    %58 = tpu.concatenate %38, %56, %57 in 0 : vector<2x128xf32>, vector<2x128xf32>, vector<4x128xf32> -> vector<8x128xf32>
    %c0_34 = arith.constant 0 : index
    %c0_35 = arith.constant 0 : index
    %59 = vector.load %arg6[%c0_34, %c0_35] : memref<8x128xf32, #tpu.memory_space<vmem>>, vector<8x128xf32>
    tpu.vector_store %arg6[%c0_34, %c0_35], %58 {strides = array<i32>} : memref<8x128xf32, #tpu.memory_space<vmem>>, vector<8x128xf32>,
    return
  }
}

</mosaic_0001>

<bundles_post_ra>
// kernel: protocon_forward.1
= control target key start
LH: loop header
LB: loop body
LE: loop exit
PB: predicated region body
PF: predicated region fallthrough
CT: control target
= control target key end

     0   :  { %vm43_vm0 = vcmask 261120   ;;  %vm1016_vm1 = vcmask 1040384   ;;  %vm1587_vm2 = vmmov 0   ;;  %vm1230_vm4 = vcmask 1041408   ;;  %s2089_s1 = inlined_call_operand.vmem [shape: f32[32,128], index: 1, kind: input, shape index: {}]   ;;  %s2090_s0 = inlined_call_operand.vmem [shape: f32[512,32], index: 0, kind: input, shape index: {}]   ;;  %s2091_s2 = inlined_call_operand.vmem [shape: f32[128,256], index: 2, kind: input, shape index: {}]   ;;  %s2092_s4 = inlined_call_operand.vmem [shape: f32[128,128], index: 4, kind: input, shape index: {}]   ;;  %s2093_s3 = inlined_call_operand.vmem [shape: f32[1,256], index: 3, kind: input, shape index: {}]   ;;  %s2094_s5 = inlined_call_operand.vmem [shape: f32[1,128], index: 5, kind: input, shape index: {}]   ;;  %s2095_s6 = inlined_call_operand.vmem [shape: f32[8,128], index: 6, kind: output, shape index: {}]  }
   0x1   :  { %v26_v0 = vld [vmem:[%s2089_s1 + $0x18] sm:$0xff]  ;;  %v25_v1 = vld [vmem:[%s2089_s1 + $0x10] sm:$0xff]  ;;  %v24_v2 = vld [vmem:[%s2089_s1 + $0x8] sm:$0xff]  ;;  %vm1248_vm7 = vcmask 1043456  }
   0x2   :  { %1417 = vmatprep.subr.mxu0 %v26_v0  ;;  %1449 = vmatprep.subr.mxu1 %v26_v0  ;;  %v1635_v3 = vld [vmem:[%s2089_s1] sm:$0xff]  ;;  %v28_v6 = vld [vmem:[%s2090_s0 + $0x8] sm:$0xff]  ;;  %v29_v8 = vld [vmem:[%s2090_s0 + $0x10] sm:$0xff] }
   0x3   :  { %1418 = vmatpush3.msra.mxu0 %v26_v0  ;;  %1450 = vmatpush3.msra.mxu1 %v26_v0  ;;  %v27_v4 = vld [vmem:[%s2090_s0] sm:$0xff]  ;;  %v276_v7 = vld [vmem:[%s2090_s0 + $0x88] sm:$0xff]  ;;  %v277_v9 = vld [vmem:[%s2090_s0 + $0x90] sm:$0xff] }
   0x4   :  { %1419 = vmatprep.subr.mxu0 %v25_v1  ;;  %1451 = vmatprep.subr.mxu1 %v25_v1  ;;  %v275_v5 = vld [vmem:[%s2090_s0 + $0x80] sm:$0xff]  ;;  %v30_v10 = vld [vmem:[%s2090_s0 + $0x18] sm:$0xff]  ;;  %v32_v14 = vld [vmem:[%s2090_s0 + $0x28] sm:$0xff] }
   0x5   :  { %1420 = vmatpush3.msra.mxu0 %v25_v1  ;;  %1452 = vmatpush3.msra.mxu1 %v25_v1  ;;  %v278_v11 = vld [vmem:[%s2090_s0 + $0x98] sm:$0xff]  ;;  %v31_v12 = vld [vmem:[%s2090_s0 + $0x20] sm:$0xff]  ;;  %v280_v15 = vld [vmem:[%s2090_s0 + $0xa8] sm:$0xff] }
   0x6   :  { %1421 = vmatprep.subr.mxu0 %v24_v2  ;;  %1453 = vmatprep.subr.mxu1 %v24_v2  ;;  %v279_v13 = vld [vmem:[%s2090_s0 + $0xa0] sm:$0xff]  ;;  %v33_v16 = vld [vmem:[%s2090_s0 + $0x30] sm:$0xff]  ;;  %v34_v18 = vld [vmem:[%s2090_s0 + $0x38] sm:$0xff] }
   0x7   :  { %1422 = vmatpush3.msra.mxu0 %v24_v2  ;;  %1454 = vmatpush3.msra.mxu1 %v24_v2  ;;  %v281_v17 = vld [vmem:[%s2090_s0 + $0xb0] sm:$0xff]  ;;  %v282_v19 = vld [vmem:[%s2090_s0 + $0xb8] sm:$0xff]  ;;  %v35_v20 = vld [vmem:[%s2090_s0 + $0x40] sm:$0xff] }
   0x8   :  { %1423 = vmatprep.subr.mxu0 %v1635_v3  ;;  %1455 = vmatprep.subr.mxu1 %v1635_v3  ;;  %v283_v21 = vld [vmem:[%s2090_s0 + $0xc0] sm:$0xff]  ;;  %v36_v22 = vld [vmem:[%s2090_s0 + $0x48] sm:$0xff]  ;;  %v37_v24 = vld [vmem:[%s2090_s0 + $0x50] sm:$0xff] }
   0x9   :  { %1424 = vmatpush3.msra.mxu0 %v1635_v3  ;;  %1425 = vmatprep.mubr.msk.f32.mxu0 %vm43_vm0, %v27_v4  ;;  %v284_v23 = vld [vmem:[%s2090_s0 + $0xc8] sm:$0xff]  ;;  %v285_v25 = vld [vmem:[%s2090_s0 + $0xd0] sm:$0xff]  ;;  %v38_v26 = vld [vmem:[%s2090_s0 + $0x58] sm:$0xff] }
   0xa   :  { %1456 = vmatpush3.msra.mxu1 %v1635_v3  ;;  %1457 = vmatprep.mubr.msk.f32.mxu1 %vm43_vm0, %v275_v5  ;;  %v286_v27 = vld [vmem:[%s2090_s0 + $0xd8] sm:$0xff]  ;;  %v39_v28 = vld [vmem:[%s2090_s0 + $0x60] sm:$0xff]  ;;  %v40_v30 = vld [vmem:[%s2090_s0 + $0x68] sm:$0xff] }
   0xb   :  { %1426 = vmatmul.mubr.msk.f32.vlgmr.msra.gmra.mxu0 %vm43_vm0, %v28_v6  ;;  %1458 = vmatmul.mubr.msk.f32.vlgmr.msra.gmra.mxu1 %vm43_vm0, %v276_v7  ;;  %v287_v29 = vld [vmem:[%s2090_s0 + $0xe0] sm:$0xff]  ;;  %v288_v31 = vld [vmem:[%s2090_s0 + $0xe8] sm:$0xff]  ;;  %v41_v32 = vld [vmem:[%s2090_s0 + $0x70] sm:$0xff] }
   0xc   :  { %1481 = vmatprep.subr.mxu0 %v26_v0  ;;  %1513 = vmatprep.subr.mxu1 %v26_v0  ;;  %v289_v33 = vld [vmem:[%s2090_s0 + $0xf0] sm:$0xff]  ;;  %v42_v34 = vld [vmem:[%s2090_s0 + $0x78] sm:$0xff]  ;;  %v522_v36 = vld [vmem:[%s2090_s0 + $0x100] sm:$0xff] }
   0xd   :  { %1482 = vmatpush3.msra.mxu0 %v26_v0  ;;  %1514 = vmatpush3.msra.mxu1 %v26_v0  ;;  %v290_v35 = vld [vmem:[%s2090_s0 + $0xf8] sm:$0xff]  ;;  %v769_v37 = vld [vmem:[%s2090_s0 + $0x180] sm:$0xff]  ;;  %v523_v38 = vld [vmem:[%s2090_s0 + $0x108] sm:$0xff] }
   0xe   :  { %1428 = vmatprep.mubr.msk.f32.mxu0 %vm43_vm0, %v29_v8  ;;  %1460 = vmatprep.mubr.msk.f32.mxu1 %vm43_vm0, %v277_v9  ;;  %v770_v39 = vld [vmem:[%s2090_s0 + $0x188] sm:$0xff]  ;;  %v524_v40 = vld [vmem:[%s2090_s0 + $0x110] sm:$0xff]  ;;  %v525_v42 = vld [vmem:[%s2090_s0 + $0x118] sm:$0xff] }
   0xf   :  { %1429 = vmatmul.mubr.msk.f32.gmra.mxu0 %vm43_vm0, %v30_v10  ;;  %1461 = vmatmul.mubr.msk.f32.gmra.mxu1 %vm43_vm0, %v278_v11  ;;  %v771_v41 = vld [vmem:[%s2090_s0 + $0x190] sm:$0xff]  ;;  %v772_v43 = vld [vmem:[%s2090_s0 + $0x198] sm:$0xff]  ;;  %v526_v44 = vld [vmem:[%s2090_s0 + $0x120] sm:$0xff] }
  0x10   :  { %1431 = vmatprep.mubr.msk.f32.mxu0 %vm43_vm0, %v31_v12  ;;  %1463 = vmatprep.mubr.msk.f32.mxu1 %vm43_vm0, %v279_v13  ;;  %v773_v45 = vld [vmem:[%s2090_s0 + $0x1a0] sm:$0xff]  ;;  %v527_v46 = vld [vmem:[%s2090_s0 + $0x128] sm:$0xff]  ;;  %v528_v48 = vld [vmem:[%s2090_s0 + $0x130] sm:$0xff] }
  0x11   :  { %1483 = vmatprep.subr.mxu0 %v25_v1  ;;  %1515 = vmatprep.subr.mxu1 %v25_v1  ;;  %v774_v47 = vld [vmem:[%s2090_s0 + $0x1a8] sm:$0xff]  ;;  %v775_v49 = vld [vmem:[%s2090_s0 + $0x1b0] sm:$0xff]  ;;  %v529_v50 = vld [vmem:[%s2090_s0 + $0x138] sm:$0xff] }
  0x12   :  { %1484 = vmatpush3.msra.mxu0 %v25_v1  ;;  %1516 = vmatpush3.msra.mxu1 %v25_v1  ;;  %v776_v51 = vld [vmem:[%s2090_s0 + $0x1b8] sm:$0xff]  ;;  %v530_v52 = vld [vmem:[%s2090_s0 + $0x140] sm:$0xff]  ;;  %v531_v54 = vld [vmem:[%s2090_s0 + $0x148] sm:$0xff] }
  0x13   :  { %1432 = vmatmul.mubr.msk.f32.gmra.mxu0 %vm43_vm0, %v32_v14  ;;  %1464 = vmatmul.mubr.msk.f32.gmra.mxu1 %vm43_vm0, %v280_v15  ;;  %v777_v53 = vld [vmem:[%s2090_s0 + $0x1c0] sm:$0xff]  ;;  %v778_v55 = vld [vmem:[%s2090_s0 + $0x1c8] sm:$0xff]  ;;  %v532_v56 = vld [vmem:[%s2090_s0 + $0x150] sm:$0xff] }
  0x14   :  { %1434 = vmatprep.mubr.msk.f32.mxu0 %vm43_vm0, %v33_v16  ;;  %1466 = vmatprep.mubr.msk.f32.mxu1 %vm43_vm0, %v281_v17  ;;  %v779_v57 = vld [vmem:[%s2090_s0 + $0x1d0] sm:$0xff]  ;;  %v533_v58 = vld [vmem:[%s2090_s0 + $0x158] sm:$0xff]  ;;  %v534_v60 = vld [vmem:[%s2090_s0 + $0x160] sm:$0xff] }
  0x15   :  { %1485 = vmatprep.subr.mxu0 %v24_v2  ;;  %1517 = vmatprep.subr.mxu1 %v24_v2  ;;  %v780_v59 = vld [vmem:[%s2090_s0 + $0x1d8] sm:$0xff]  ;;  %v781_v61 = vld [vmem:[%s2090_s0 + $0x1e0] sm:$0xff]  ;;  %v535_v62 = vld [vmem:[%s2090_s0 + $0x168] sm:$0xff] }
  0x16   :  { %1486 = vmatpush3.msra.mxu0 %v24_v2  ;;  %1518 = vmatpush3.msra.mxu1 %v24_v2  ;;  %v782_v63 = vld [vmem:[%s2090_s0 + $0x1e8] sm:$0xff]  ;;  %v536_v0 = vld [vmem:[%s2090_s0 + $0x170] sm:$0xff]  ;;  %v537_v2 = vld [vmem:[%s2090_s0 + $0x178] sm:$0xff] }
  0x17   :  { %1435 = vmatmul.mubr.msk.f32.gmra.mxu0 %vm43_vm0, %v34_v18  ;;  %1467 = vmatmul.mubr.msk.f32.gmra.mxu1 %vm43_vm0, %v282_v19  ;;  %v783_v1 = vld [vmem:[%s2090_s0 + $0x1f0] sm:$0xff]  ;;  %v1049_v4 = vld [vmem:[%s2091_s2 + $0xf8] sm:$0xff]  ;;  %v1047_v6 = vld [vmem:[%s2091_s2 + $0xe8] sm:$0xff] }
  0x18   :  { %1437 = vmatprep.mubr.msk.f32.mxu0 %vm43_vm0, %v35_v20  ;;  %1469 = vmatprep.mubr.msk.f32.mxu1 %vm43_vm0, %v283_v21  ;;  %v1048_v5 = vld [vmem:[%s2091_s2 + $0xf0] sm:$0xff]  ;;  %v1046_v7 = vld [vmem:[%s2091_s2 + $0xe0] sm:$0xff]  ;;  %v1045_v8 = vld [vmem:[%s2091_s2 + $0xd8] sm:$0xff] }
  0x19   :  { %1487 = vmatprep.subr.mxu0 %v1635_v3  ;;  %1519 = vmatprep.subr.mxu1 %v1635_v3  ;;  %v1044_v9 = vld [vmem:[%s2091_s2 + $0xd0] sm:$0xff]  ;;  %v1043_v10 = vld [vmem:[%s2091_s2 + $0xc8] sm:$0xff]  ;;  %v1042_v11 = vld [vmem:[%s2091_s2 + $0xc0] sm:$0xff] }
  0x1a   :  { %1488 = vmatpush3.msra.mxu0 %v1635_v3  ;;  %1520 = vmatpush3.msra.mxu1 %v1635_v3  ;;  %v784_v3 = vld [vmem:[%s2090_s0 + $0x1f8] sm:$0xff]  ;;  %v1040_v13 = vld [vmem:[%s2091_s2 + $0xb0] sm:$0xff]  ;;  %v1039_v14 = vld [vmem:[%s2091_s2 + $0xa8] sm:$0xff] }
  0x1b   :  { %1438 = vmatmul.mubr.msk.f32.gmra.mxu0 %vm43_vm0, %v36_v22  ;;  %1470 = vmatmul.mubr.msk.f32.gmra.mxu1 %vm43_vm0, %v284_v23  ;;  %v1041_v12 = vld [vmem:[%s2091_s2 + $0xb8] sm:$0xff]  ;;  %v1038_v15 = vld [vmem:[%s2091_s2 + $0xa0] sm:$0xff]  ;;  %v1036_v17 = vld [vmem:[%s2091_s2 + $0x90] sm:$0xff] }
  0x1c   :  { %1440 = vmatprep.mubr.msk.f32.mxu0 %vm43_vm0, %v37_v24  ;;  %1472 = vmatprep.mubr.msk.f32.mxu1 %vm43_vm0, %v285_v25  ;;  %v1037_v16 = vld [vmem:[%s2091_s2 + $0x98] sm:$0xff]  ;;  %v1035_v18 = vld [vmem:[%s2091_s2 + $0x88] sm:$0xff]  ;;  %v1034_v19 = vld [vmem:[%s2091_s2 + $0x80] sm:$0xff] }
  0x1d   :  { %1062 = vmatprep.subr.mxu0 %v1049_v4  ;;  %v1033_v20 = vld [vmem:[%s2091_s2 + $0x78] sm:$0xff]  ;;  %v1032_v21 = vld [vmem:[%s2091_s2 + $0x70] sm:$0xff]  ;;  %v1031_v22 = vld [vmem:[%s2091_s2 + $0x68] sm:$0xff] }
  0x1e   :  { %v1030_v23 = vld [vmem:[%s2091_s2 + $0x60] sm:$0xff]  ;;  %v1029_v24 = vld [vmem:[%s2091_s2 + $0x58] sm:$0xff]  ;;  %v1028_v25 = vld [vmem:[%s2091_s2 + $0x50] sm:$0xff] }
  0x1f   :  { %1441 = vmatmul.mubr.msk.f32.gmra.mxu0 %vm43_vm0, %v38_v26  ;;  %1473 = vmatmul.mubr.msk.f32.gmra.mxu1 %vm43_vm0, %v286_v27  ;;  %v1027_v26 = vld [vmem:[%s2091_s2 + $0x48] sm:$0xff]  ;;  %v1026_v27 = vld [vmem:[%s2091_s2 + $0x40] sm:$0xff] }
  0x20   :  { %1443 = vmatprep.mubr.msk.f32.mxu0 %vm43_vm0, %v39_v28  ;;  %1475 = vmatprep.mubr.msk.f32.mxu1 %vm43_vm0, %v287_v29  ;;  %v1025_v28 = vld [vmem:[%s2091_s2 + $0x38] sm:$0xff]  ;;  %v1024_v29 = vld [vmem:[%s2091_s2 + $0x30] sm:$0xff] }
  0x23   :  { %1444 = vmatmul.mubr.msk.f32.gmra.mxu0 %vm43_vm0, %v40_v30  ;;  %1476 = vmatmul.mubr.msk.f32.gmra.mxu1 %vm43_vm0, %v288_v31  ;;  %v1023_v30 = vld [vmem:[%s2091_s2 + $0x28] sm:$0xff]  ;;  %v1022_v31 = vld [vmem:[%s2091_s2 + $0x20] sm:$0xff] }
  0x24   :  { %1446 = vmatprep.mubr.msk.f32.mxu0 %vm43_vm0, %v41_v32  ;;  %1478 = vmatprep.mubr.msk.f32.mxu1 %vm43_vm0, %v289_v33  ;;  %v1021_v32 = vld [vmem:[%s2091_s2 + $0x18] sm:$0xff]  ;;  %v1020_v33 = vld [vmem:[%s2091_s2 + $0x10] sm:$0xff] }
  0x27   :  { %1447 = vmatmul.mubr.msk.f32.gmra.mxu0 %vm43_vm0, %v42_v34  ;;  %1479 = vmatmul.mubr.msk.f32.gmra.mxu1 %vm43_vm0, %v290_v35  ;;  %v1019_v34 = vld [vmem:[%s2091_s2 + $0x8] sm:$0xff]  ;;  %v1018_v35 = vld [vmem:[%s2091_s2] sm:$0xff] }
  0x28   :  { %1489 = vmatprep.mubr.msk.f32.mxu0 %vm43_vm0, %v522_v36  ;;  %1521 = vmatprep.mubr.msk.f32.mxu1 %vm43_vm0, %v769_v37  ;;  %v1586_v36 = vmov 0.0   ;;  %v1151_v37 = vld [vmem:[%s2092_s4 + $0x78] sm:$0xff] }
  0x29   :  { %1545 = vmatprep.subr.mxu1 %v1586_v36 }
  0x2b   :  { %1490 = vmatmul.mubr.msk.f32.vlgmr.msra.gmra.mxu0 %vm43_vm0, %v523_v38  ;;  %1522 = vmatmul.mubr.msk.f32.vlgmr.msra.gmra.mxu1 %vm43_vm0, %v770_v39  ;;  %v1150_v38 = vld [vmem:[%s2092_s4 + $0x70] sm:$0xff]  ;;  %v1149_v39 = vld [vmem:[%s2092_s4 + $0x68] sm:$0xff] }
  0x2c   :  { %1492 = vmatprep.mubr.msk.f32.mxu0 %vm43_vm0, %v524_v40  ;;  %1524 = vmatprep.mubr.msk.f32.mxu1 %vm43_vm0, %v771_v41  ;;  %v1148_v40 = vld [vmem:[%s2092_s4 + $0x60] sm:$0xff]  ;;  %v1147_v41 = vld [vmem:[%s2092_s4 + $0x58] sm:$0xff] }
  0x2d   :  { %1063 = vmatpush1.msra.mxu0 %v1048_v5  ;;  %1546 = vmatpush3.msra.mxu1 %v1151_v37 }
  0x2e   :  { %1064 = vmatprep.subr.mxu0 %v1047_v6  ;;  %1547 = vmatprep.subr.mxu1 %v1586_v36 }
  0x2f   :  { %1493 = vmatmul.mubr.msk.f32.gmra.mxu0 %vm43_vm0, %v525_v42  ;;  %1525 = vmatmul.mubr.msk.f32.gmra.mxu1 %vm43_vm0, %v772_v43  ;;  %v1146_v42 = vld [vmem:[%s2092_s4 + $0x50] sm:$0xff]  ;;  %v1145_v43 = vld [vmem:[%s2092_s4 + $0x48] sm:$0xff] }
  0x30   :  { %1495 = vmatprep.mubr.msk.f32.mxu0 %vm43_vm0, %v526_v44  ;;  %1527 = vmatprep.mubr.msk.f32.mxu1 %vm43_vm0, %v773_v45  ;;  %v1144_v44 = vld [vmem:[%s2092_s4 + $0x40] sm:$0xff]  ;;  %v1143_v45 = vld [vmem:[%s2092_s4 + $0x38] sm:$0xff] }
  0x31   :  { %1065 = vmatpush1.msra.mxu0 %v1046_v7  ;;  %1548 = vmatpush3.msra.mxu1 %v1150_v38 }
  0x32   :  { %1066 = vmatprep.subr.mxu0 %v1045_v8  ;;  %1549 = vmatprep.subr.mxu1 %v1586_v36 }
  0x33   :  { %1496 = vmatmul.mubr.msk.f32.gmra.mxu0 %vm43_vm0, %v527_v46  ;;  %1528 = vmatmul.mubr.msk.f32.gmra.mxu1 %vm43_vm0, %v774_v47  ;;  %v1142_v46 = vld [vmem:[%s2092_s4 + $0x30] sm:$0xff]  ;;  %v1141_v47 = vld [vmem:[%s2092_s4 + $0x28] sm:$0xff] }
  0x34   :  { %1498 = vmatprep.mubr.msk.f32.mxu0 %vm43_vm0, %v528_v48  ;;  %1530 = vmatprep.mubr.msk.f32.mxu1 %vm43_vm0, %v775_v49  ;;  %v1140_v48 = vld [vmem:[%s2092_s4 + $0x20] sm:$0xff]  ;;  %v1139_v49 = vld [vmem:[%s2092_s4 + $0x18] sm:$0xff] }
  0x35   :  { %1067 = vmatpush1.msra.mxu0 %v1044_v9  ;;  %1550 = vmatpush3.msra.mxu1 %v1149_v39 }
  0x36   :  { %1068 = vmatprep.subr.mxu0 %v1043_v10  ;;  %1551 = vmatprep.subr.mxu1 %v1586_v36 }
  0x37   :  { %1499 = vmatmul.mubr.msk.f32.gmra.mxu0 %vm43_vm0, %v529_v50  ;;  %1531 = vmatmul.mubr.msk.f32.gmra.mxu1 %vm43_vm0, %v776_v51 }
  0x38   :  { %1501 = vmatprep.mubr.msk.f32.mxu0 %vm43_vm0, %v530_v52  ;;  %1533 = vmatprep.mubr.msk.f32.mxu1 %vm43_vm0, %v777_v53 }
  0x39   :  { %1069 = vmatpush1.msra.mxu0 %v1042_v11  ;;  %1552 = vmatpush3.msra.mxu1 %v1148_v40 }
  0x3a   :  { %1070 = vmatprep.subr.mxu0 %v1041_v12  ;;  %1553 = vmatprep.subr.mxu1 %v1586_v36 }
  0x3b   :  { %1502 = vmatmul.mubr.msk.f32.gmra.mxu0 %vm43_vm0, %v531_v54  ;;  %1534 = vmatmul.mubr.msk.f32.gmra.mxu1 %vm43_vm0, %v778_v55 }
  0x3c   :  { %1504 = vmatprep.mubr.msk.f32.mxu0 %vm43_vm0, %v532_v56  ;;  %1536 = vmatprep.mubr.msk.f32.mxu1 %vm43_vm0, %v779_v57 }
  0x3d   :  { %1071 = vmatpush1.msra.mxu0 %v1040_v13  ;;  %1554 = vmatpush3.msra.mxu1 %v1147_v41 }
  0x3e   :  { %1072 = vmatprep.subr.mxu0 %v1039_v14  ;;  %1555 = vmatprep.subr.mxu1 %v1586_v36 }
  0x3f   :  { %1505 = vmatmul.mubr.msk.f32.gmra.mxu0 %vm43_vm0, %v533_v58  ;;  %1537 = vmatmul.mubr.msk.f32.gmra.mxu1 %vm43_vm0, %v780_v59 }
  0x40   :  { %1507 = vmatprep.mubr.msk.f32.mxu0 %vm43_vm0, %v534_v60  ;;  %1539 = vmatprep.mubr.msk.f32.mxu1 %vm43_vm0, %v781_v61 }
  0x41   :  { %1073 = vmatpush1.msra.mxu0 %v1038_v15  ;;  %1556 = vmatpush3.msra.mxu1 %v1146_v42 }
  0x42   :  { %1074 = vmatprep.subr.mxu0 %v1037_v16  ;;  %1557 = vmatprep.subr.mxu1 %v1586_v36 }
  0x43   :  { %1508 = vmatmul.mubr.msk.f32.gmra.mxu0 %vm43_vm0, %v535_v62  ;;  %1540 = vmatmul.mubr.msk.f32.gmra.mxu1 %vm43_vm0, %v782_v63 }
  0x44   :  { %1510 = vmatprep.mubr.msk.f32.mxu0 %vm43_vm0, %v536_v0  ;;  %1542 = vmatprep.mubr.msk.f32.mxu1 %vm43_vm0, %v783_v1 }
  0x45   :  { %1075 = vmatpush1.msra.mxu0 %v1036_v17  ;;  %1558 = vmatpush3.msra.mxu1 %v1145_v43 }
  0x46   :  { %1076 = vmatprep.subr.mxu0 %v1035_v18  ;;  %1559 = vmatprep.subr.mxu1 %v1586_v36 }
  0x47   :  { %1511 = vmatmul.mubr.msk.f32.gmra.mxu0 %vm43_vm0, %v537_v2  ;;  %1543 = vmatmul.mubr.msk.f32.gmra.mxu1 %vm43_vm0, %v784_v3 }
  0x48   :  { %1077 = vmatpush1.msra.mxu0 %v1034_v19  ;;  %1126 = vmatprep.mubr.f32.mxu0 %v1586_v36 }
  0x49   :  { %1078 = vmatprep.subr.mxu0 %v1033_v20  ;;  %1560 = vmatpush3.msra.mxu1 %v1144_v44 }
  0x4a   :  { %1079 = vmatpush1.msra.mxu0 %v1032_v21  ;;  %1561 = vmatprep.subr.mxu1 %v1586_v36 }
  0x4b   :  { %1080 = vmatprep.subr.mxu0 %v1031_v22  ;;  %1562 = vmatpush3.msra.mxu1 %v1143_v45 }
  0x4c   :  { %1081 = vmatpush1.msra.mxu0 %v1030_v23  ;;  %1563 = vmatprep.subr.mxu1 %v1586_v36 }
  0x4d   :  { %1082 = vmatprep.subr.mxu0 %v1029_v24  ;;  %1564 = vmatpush3.msra.mxu1 %v1142_v46 }
  0x4e   :  { %1083 = vmatpush1.msra.mxu0 %v1028_v25  ;;  %1565 = vmatprep.subr.mxu1 %v1586_v36 }
  0x4f   :  { %1084 = vmatprep.subr.mxu0 %v1027_v26  ;;  %1566 = vmatpush3.msra.mxu1 %v1141_v47 }
  0x50   :  { %1085 = vmatpush1.msra.mxu0 %v1026_v27  ;;  %1567 = vmatprep.subr.mxu1 %v1586_v36 }
  0x51   :  { %1086 = vmatprep.subr.mxu0 %v1025_v28  ;;  %1568 = vmatpush3.msra.mxu1 %v1140_v48 }
  0x52   :  { %1087 = vmatpush1.msra.mxu0 %v1024_v29  ;;  %1569 = vmatprep.subr.mxu1 %v1586_v36 }
  0x53   :  { %1088 = vmatprep.subr.mxu0 %v1023_v30  ;;  %1570 = vmatpush3.msra.mxu1 %v1139_v49 }
  0x54   :  { %1089 = vmatpush1.msra.mxu0 %v1022_v31  ;;  %1571 = vmatprep.subr.mxu1 %v1586_v36 }
  0x55   :  { %1090 = vmatprep.subr.mxu0 %v1021_v32  ;;  %1577 = vmatprep.mubr.msk.f32.mxu1 %vm1587_vm2, %v1586_v36 }
  0x56   :  { %1091 = vmatpush1.msra.mxu0 %v1020_v33 }
  0x57   :  { %1092 = vmatprep.subr.mxu0 %v1019_v34 }
  0x58   :  { %1093 = vmatpush1.msra.mxu0 %v1018_v35 }
  0xcb   :  { %v1427_v50 = vpop.f32.mrf.mxu0  ;;  %v1459_v51 = vpop.f32.mrf.mxu1 }
  0xcc   :  { %v238_v58 = vmax.f32 %v1427_v50, 0.0  ;;  %v485_v59 = vmax.f32 %v1459_v51, 0.0 }
  0xcd   :  { %v158_v52 = vpop.f32.mrf.mxu0  ;;  %v405_v53 = vpop.f32.mrf.mxu1 }
  0xce   :  { %v237_v54 = vmax.f32 %v158_v52, 0.0  ;;  %v484_v55 = vmax.f32 %v405_v53, 0.0 }
  0xcf   :  { %v1430_v56 = vpop.f32.mrf.mxu0  ;;  %v1462_v57 = vpop.f32.mrf.mxu1 }
  0xd0   :  { %v253_v62 = vadd.f32 %v238_v58, %v237_v54  ;;  %v500_v63 = vadd.f32 %v485_v59, %v484_v55  ;;  %v240_v4 = vmax.f32 %v1430_v56, 0.0  ;;  %v487_v5 = vmax.f32 %v1462_v57, 0.0 }
  0xd1   :  { %v168_v60 = vpop.f32.mrf.mxu0  ;;  %v415_v61 = vpop.f32.mrf.mxu1 }
  0xd2   :  { %v239_v0 = vmax.f32 %v168_v60, 0.0  ;;  %v486_v1 = vmax.f32 %v415_v61, 0.0 }
  0xd3   :  { %v1433_v2 = vpop.f32.mrf.mxu0  ;;  %v1465_v3 = vpop.f32.mrf.mxu1 }
  0xd4   :  { %v254_v6 = vadd.f32 %v253_v62, %v239_v0  ;;  %v501_v7 = vadd.f32 %v500_v63, %v486_v1  ;;  %v242_v16 = vmax.f32 %v1433_v2, 0.0  ;;  %v489_v17 = vmax.f32 %v1465_v3, 0.0 }
  0xd5   :  { %v178_v8 = vpop.f32.mrf.mxu0  ;;  %v425_v9 = vpop.f32.mrf.mxu1 }
  0xd6   :  { %v241_v10 = vmax.f32 %v178_v8, 0.0  ;;  %v255_v11 = vadd.f32 %v254_v6, %v240_v4  ;;  %v488_v12 = vmax.f32 %v425_v9, 0.0  ;;  %v502_v13 = vadd.f32 %v501_v7, %v487_v5 }
  0xd7   :  { %v1436_v14 = vpop.f32.mrf.mxu0  ;;  %v1468_v15 = vpop.f32.mrf.mxu1 }
  0xd8   :  { %v256_v18 = vadd.f32 %v255_v11, %v241_v10  ;;  %v503_v19 = vadd.f32 %v502_v13, %v488_v12  ;;  %v244_v32 = vmax.f32 %v1436_v14, 0.0  ;;  %v491_v33 = vmax.f32 %v1468_v15, 0.0 }
  0xd9   :  { %v188_v20 = vpop.f32.mrf.mxu0  ;;  %v435_v21 = vpop.f32.mrf.mxu1 }
  0xda   :  { %v243_v22 = vmax.f32 %v188_v20, 0.0  ;;  %v257_v23 = vadd.f32 %v256_v18, %v242_v16  ;;  %v490_v24 = vmax.f32 %v435_v21, 0.0  ;;  %v504_v25 = vadd.f32 %v503_v19, %v489_v17 }
  0xdb   :  { %v1439_v26 = vpop.f32.mrf.mxu0  ;;  %v1471_v27 = vpop.f32.mrf.mxu1 }
  0xdc   :  { %v258_v28 = vadd.f32 %v257_v23, %v243_v22  ;;  %v505_v29 = vadd.f32 %v504_v25, %v490_v24  ;;  %v246_v49 = vmax.f32 %v1439_v26, 0.0  ;;  %v493_v50 = vmax.f32 %v1471_v27, 0.0 }
  0xdd   :  { %v198_v30 = vpop.f32.mrf.mxu0  ;;  %v445_v31 = vpop.f32.mrf.mxu1 }
  0xde   :  { %v245_v37 = vmax.f32 %v198_v30, 0.0  ;;  %v259_v38 = vadd.f32 %v258_v28, %v244_v32  ;;  %v492_v39 = vmax.f32 %v445_v31, 0.0  ;;  %v506_v40 = vadd.f32 %v505_v29, %v491_v33 }
  0xdf   :  { %v1442_v34 = vpop.f32.mrf.mxu0  ;;  %v1474_v35 = vpop.f32.mrf.mxu1 }
  0xe0   :  { %v260_v45 = vadd.f32 %v259_v38, %v245_v37  ;;  %v507_v46 = vadd.f32 %v506_v40, %v492_v39  ;;  %v248_v1 = vmax.f32 %v1442_v34, 0.0  ;;  %v495_v4 = vmax.f32 %v1474_v35, 0.0 }
  0xe1   :  { %v208_v41 = vpop.f32.mrf.mxu0  ;;  %v455_v42 = vpop.f32.mrf.mxu1 }
  0xe2   :  { %v247_v53 = vmax.f32 %v208_v41, 0.0  ;;  %v261_v54 = vadd.f32 %v260_v45, %v246_v49  ;;  %v494_v55 = vmax.f32 %v455_v42, 0.0  ;;  %v508_v56 = vadd.f32 %v507_v46, %v493_v50 }
  0xe3   :  { %v1445_v43 = vpop.f32.mrf.mxu0  ;;  %v2051_v44 = vpop.f32.mrf.mxu1 }
  0xe4   :  { %v262_v61 = vadd.f32 %v261_v54, %v247_v53  ;;  %v509_v62 = vadd.f32 %v508_v56, %v494_v55  ;;  %v250_v29 = vmax.f32 %v1445_v43, 0.0  ;;  %v497_v32 = vmax.f32 %v2051_v44, 0.0 }
  0xe5   :  { %v218_v47 = vpop.f32.mrf.mxu0  ;;  %v465_v48 = vpop.f32.mrf.mxu1 }
  0xe6   :  { %v249_v7 = vmax.f32 %v218_v47, 0.0  ;;  %v263_v8 = vadd.f32 %v262_v61, %v248_v1  ;;  %v496_v11 = vmax.f32 %v465_v48, 0.0  ;;  %v510_v12 = vadd.f32 %v509_v62, %v495_v4 }
  0xe7   :  { %v2053_v51 = vpop.f32.mrf.mxu0  ;;  %v2055_v52 = vpop.f32.mrf.mxu1 }
  0xe8   :  { %v264_v21 = vadd.f32 %v263_v8, %v249_v7  ;;  %v511_v25 = vadd.f32 %v510_v12, %v496_v11  ;;  %v499_v4 = vmax.f32 %v2055_v52, 0.0 }
  0xe9   :  { %v2057_v57 = vpop.f32.mrf.mxu0  ;;  %v2059_v58 = vpop.f32.mrf.mxu1 }
  0xea   :  { %v251_v38 = vmax.f32 %v2057_v57, 0.0  ;;  %v265_v39 = vadd.f32 %v264_v21, %v250_v29  ;;  %v498_v42 = vmax.f32 %v2059_v58, 0.0  ;;  %v512_v45 = vadd.f32 %v511_v25, %v497_v32 }
  0xeb   :  { %v1491_v59 = vpop.f32.mrf.mxu0  ;;  %v1523_v60 = vpop.f32.mrf.mxu1 }
  0xec   :  { %v732_v9 = vmax.f32 %v1491_v59, 0.0  ;;  %v979_v10 = vmax.f32 %v1523_v60, 0.0  ;;  %v266_v60 = vadd.f32 %v265_v39, %v251_v38  ;;  %v513_v57 = vadd.f32 %v512_v45, %v498_v42 }
  0xed   :  { %v652_v63 = vpop.f32.mrf.mxu0  ;;  %v899_v0 = vpop.f32.mrf.mxu1 }
  0xee   :  { %v731_v2 = vmax.f32 %v652_v63, 0.0  ;;  %v978_v3 = vmax.f32 %v899_v0, 0.0  ;;  %v514_v11 = vadd.f32 %v513_v57, %v499_v4 }
  0xef   :  { %v1494_v5 = vpop.f32.mrf.mxu0  ;;  %v1526_v6 = vpop.f32.mrf.mxu1 }
  0xf0   :  { %v747_v15 = vadd.f32 %v732_v9, %v731_v2  ;;  %v994_v16 = vadd.f32 %v979_v10, %v978_v3  ;;  %v734_v22 = vmax.f32 %v1494_v5, 0.0  ;;  %v981_v26 = vmax.f32 %v1526_v6, 0.0 }
  0xf1   :  { %v662_v13 = vpop.f32.mrf.mxu0  ;;  %v909_v14 = vpop.f32.mrf.mxu1  ;;  %v252_v3 = vmax.f32 %v2053_v51, 0.0 }
  0xf2   :  { %v733_v17 = vmax.f32 %v662_v13, 0.0  ;;  %v980_v18 = vmax.f32 %v909_v14, 0.0 }
  0xf3   :  { %v1497_v19 = vpop.f32.mrf.mxu0  ;;  %v1529_v20 = vpop.f32.mrf.mxu1  ;;  %v267_v10 = vadd.f32 %v266_v60, %v252_v3 }
  0xf4   :  { %v748_v23 = vadd.f32 %v747_v15, %v733_v17  ;;  %v995_v24 = vadd.f32 %v994_v16, %v980_v18  ;;  %v736_v40 = vmax.f32 %v1497_v19, 0.0  ;;  %v983_v46 = vmax.f32 %v1529_v20, 0.0 }
  0xf5   :  { %v672_v27 = vpop.f32.mrf.mxu0  ;;  %v919_v28 = vpop.f32.mrf.mxu1  ;;  %v268_v52 = vrot.slane %v267_v10, 4 }
  0xf6   :  { %v735_v30 = vmax.f32 %v672_v27, 0.0  ;;  %v749_v31 = vadd.f32 %v748_v23, %v734_v22  ;;  %v982_v33 = vmax.f32 %v919_v28, 0.0  ;;  %v996_v34 = vadd.f32 %v995_v24, %v981_v26 }
  0xf7   :  { %v1500_v35 = vpop.f32.mrf.mxu0  ;;  %v1532_v37 = vpop.f32.mrf.mxu1  ;;  %v515_v23 = vrot.slane %v514_v11, 4 }
  0xf8   :  { %v750_v41 = vadd.f32 %v749_v31, %v735_v30  ;;  %v997_v47 = vadd.f32 %v996_v34, %v982_v33  ;;  %v738_v56 = vmax.f32 %v1500_v35, 0.0  ;;  %v985_v61 = vmax.f32 %v1532_v37, 0.0 }
  0xf9   :  { %v682_v48 = vpop.f32.mrf.mxu0  ;;  %v929_v43 = vpop.f32.mrf.mxu1  ;;  %v269_v37 = vadd.f32 %v268_v52, %v267_v10  ;;  %v516_v38 = vadd.f32 %v515_v23, %v514_v11 }
  0xfa   :  { %v737_v49 = vmax.f32 %v682_v48, 0.0  ;;  %v751_v50 = vadd.f32 %v750_v41, %v736_v40  ;;  %v984_v53 = vmax.f32 %v929_v43, 0.0  ;;  %v998_v44 = vadd.f32 %v997_v47, %v983_v46 }
  0xfb   :  { %v1503_v54 = vpop.f32.mrf.mxu0  ;;  %v1535_v55 = vpop.f32.mrf.mxu1 }
  0xfc   :  { %v752_v59 = vadd.f32 %v751_v50, %v737_v49  ;;  %v999_v62 = vadd.f32 %v998_v44, %v984_v53  ;;  %v740_v8 = vmax.f32 %v1503_v54, 0.0  ;;  %v987_v12 = vmax.f32 %v1535_v55, 0.0 }
  0xfd   :  { %v692_v63 = vpop.f32.mrf.mxu0  ;;  %v939_v0 = vpop.f32.mrf.mxu1  ;;  %v270_v50 = vrot.slane %v269_v37, 2  ;;  %v517_v53 = vrot.slane %v516_v38, 2 }
  0xfe   :  { %v739_v58 = vmax.f32 %v692_v63, 0.0  ;;  %v753_v1 = vadd.f32 %v752_v59, %v738_v56  ;;  %v986_v2 = vmax.f32 %v939_v0, 0.0  ;;  %v1000_v5 = vadd.f32 %v999_v62, %v985_v61 }
  0xff   :  { %v1506_v6 = vpop.f32.mrf.mxu0  ;;  %v1538_v7 = vpop.f32.mrf.mxu1  ;;  %v271_v60 = vadd.f32 %v270_v50, %v269_v37  ;;  %v518_v57 = vadd.f32 %v517_v53, %v516_v38 }
 0x100   :  { %v754_v9 = vadd.f32 %v753_v1, %v739_v58  ;;  %v1001_v13 = vadd.f32 %v1000_v5, %v986_v2  ;;  %v742_v51 = vmax.f32 %v1506_v6, 0.0  ;;  %v989_v24 = vmax.f32 %v1538_v7, 0.0 }
 0x101   :  { %v702_v14 = vpop.f32.mrf.mxu0  ;;  %v949_v15 = vpop.f32.mrf.mxu1  ;;  %v272_v58 = vrot.slane %v271_v60, 1  ;;  %v519_v1 = vrot.slane %v518_v57, 1 }
 0x102   :  { %v741_v16 = vmax.f32 %v702_v14, 0.0  ;;  %v755_v17 = vadd.f32 %v754_v9, %v740_v8  ;;  %v988_v18 = vmax.f32 %v949_v15, 0.0  ;;  %v1002_v19 = vadd.f32 %v1001_v13, %v987_v12  ;;  %v1138_v14 = vld [vmem:[%s2092_s4 + $0x10] sm:$0xff]  ;;  %v1137_v15 = vld [vmem:[%s2092_s4 + $0x8] sm:$0xff] }
 0x103   :  { %v1509_v20 = vpop.f32.mrf.mxu0  ;;  %v1541_v21 = vpop.f32.mrf.mxu1  ;;  %v273_v6 = vadd.f32 %v272_v58, %v271_v60  ;;  %v520_v7 = vadd.f32 %v519_v1, %v518_v57  ;;  %1572 = vmatpush3.msra.mxu1 %v1138_v14 }
 0x104   :  { %v756_v22 = vadd.f32 %v755_v17, %v741_v16  ;;  %v1003_v25 = vadd.f32 %v1002_v19, %v988_v18  ;;  %v744_v34 = vmax.f32 %v1509_v20, 0.0  ;;  %v991_v39 = vmax.f32 %v1541_v21, 0.0  ;;  %1573 = vmatprep.subr.mxu1 %v1586_v36  ;;  %v1136_v16 = vld [vmem:[%s2092_s4] sm:$0xff] }
 0x105   :  { %v712_v26 = vpop.f32.mrf.mxu0  ;;  %v959_v27 = vpop.f32.mrf.mxu1  ;;  %v521_v11 = vadd.f32 %v520_v7, %v273_v6  ;;  %1574 = vmatpush3.msra.mxu1 %v1137_v15  ;;  %v1052_v17 = vlaneseq  ;;  %v1050_v20 = vld [vmem:[%s2093_s3] sm:$0x3] }
 0x106   :  { %v743_v28 = vmax.f32 %v712_v26, 0.0  ;;  %v757_v29 = vadd.f32 %v756_v22, %v742_v51  ;;  %v990_v30 = vmax.f32 %v959_v27, 0.0  ;;  %v1004_v31 = vadd.f32 %v1003_v25, %v989_v24  ;;  %1575 = vmatprep.subr.mxu1 %v1586_v36  ;;  %v1319_v24 = vld [vmem:[%s2094_s5] ss:$0 sm:$0xff] }
 0x107   :  { %v1512_v32 = vpop.f32.mrf.mxu0  ;;  %v1544_v33 = vpop.f32.mrf.mxu1  ;;  %1576 = vmatpush3.msra.mxu1 %v1136_v16  ;;  %v1053_v18 = vshrl.u32 %v1052_v17, 7 }
 0x108   :  { %v758_v35 = vadd.f32 %v757_v29, %v743_v28  ;;  %v1005_v40 = vadd.f32 %v1004_v31, %v990_v30  ;;  %v746_v43 = vmax.f32 %v1512_v32, 0.0  ;;  %v993_v44 = vmax.f32 %v1544_v33, 0.0 }
 0x109   :  { %v722_v41 = vpop.f32.mrf.mxu0  ;;  %v969_v42 = vpop.f32.mrf.mxu1  ;;  %v1054_v19 = vsub.s32 0, %v1053_v18  ;;  %v1058_v37 = vsub.s32 1, %v1053_v18 }
 0x10a   :  { %v745_v45 = vmax.f32 %v722_v41, 0.0  ;;  %v759_v46 = vadd.f32 %v758_v35, %v744_v34  ;;  %v992_v47 = vmax.f32 %v969_v42, 0.0  ;;  %v1006_v48 = vadd.f32 %v1005_v40, %v991_v39 }
 0x10b   :  { %v1055_v21 = vrot.slane %v1050_v20, %v1054_v19  ;;  %v1059_v38 = vrot.slane %v1050_v20, %v1058_v37 }
 0x10c   :  { %v760_v49 = vadd.f32 %v759_v46, %v745_v45  ;;  %v1007_v54 = vadd.f32 %v1006_v48, %v992_v47 }
 0x10e   :  { %v761_v55 = vadd.f32 %v760_v49, %v746_v43  ;;  %v1008_v56 = vadd.f32 %v1007_v54, %v993_v44 }
 0x110   :  { %v762_v59 = vrot.slane %v761_v55, 4  ;;  %v1009_v61 = vrot.slane %v1008_v56, 4 }
 0x112   :  { %v763_v62 = vadd.f32 %v762_v59, %v761_v55  ;;  %v1010_v63 = vadd.f32 %v1009_v61, %v1008_v56 }
 0x114   :  { %v764_v0 = vrot.slane %v763_v62, 2  ;;  %v1011_v2 = vrot.slane %v1010_v63, 2 }
 0x116   :  { %v765_v3 = vadd.f32 %v764_v0, %v763_v62  ;;  %v1012_v4 = vadd.f32 %v1011_v2, %v1010_v63 }
 0x118   :  { %v766_v5 = vrot.slane %v765_v3, 1  ;;  %v1013_v8 = vrot.slane %v1012_v4, 1 }
 0x11a   :  { %v767_v9 = vadd.f32 %v766_v5, %v765_v3  ;;  %v1014_v10 = vadd.f32 %v1013_v8, %v1012_v4 }
 0x11c   :  { %v1015_v12 = vadd.f32 %v1014_v10, %v767_v9 }
 0x11e   :  { %v1017_v13 = vsel %vm1016_vm1, %v521_v11, %v1015_v12 }
 0x11f   :  { %1127 = vmatmul.mubr.f32.vlgmr.msra.gmra.mxu0 %v1017_v13 }
 0x1df   :  { %v1128_v51 = vpop.f32.mrf.mxu0 }
 0x1e0   :  { %v1129_v22 = vadd.f32 %v1128_v51, %v1055_v21 }
 0x1e1   :  { %v1130_v40 = vpop.f32.mrf.mxu0 }
 0x1e2   :  { %vm1133_vm3 = vcmp.ge.f32.partialorder %v1129_v22, 0.0  ;;  %v1134_v52 = vmul.f32 0.1, %v1129_v22  ;;  %v1131_v42 = vadd.f32 %v1130_v40, %v1059_v38 }
 0x1e4   :  { %v1135_v23 = vsel %vm1133_vm3, %v1129_v22, %v1134_v52 }
 0x1e5   :  { %1578 = vmatmul.mubr.f32.vlgmr.msra.gmra.mxu1 %v1135_v23 }
 0x2a5   :  { %v1225_v25 = vpop.f32.mrf.mxu1 }
 0x2a6   :  { %v1226_v36 = vadd.f32 %v1319_v24, %v1225_v25 }
 0x2a7   :  { %v1579_v26 = vpop.f32.mrf.mxu1 }
 0x2a8   :  { %v1229_v27 = vmul.f32 %v1226_v36, %v1226_v36 }
 0x2aa   :  { %v1231_v28 = vsel %vm1230_vm4, %v1229_v27, 0.0 }
 0x2ab   :  { %1232 = vadd.xlane.f32.xlu0 %v1231_v28 }
 0x334   :  { %v1233_v29 = vpop.xlane.xlu0 %1232 }
 0x335   :  { %1582 = vrsqrt.f32 %v1233_v29  ;;  %vm1236_vm5 = vcmp.eq.f32.partialorder %v1233_v29, inf  ;;  %v1239_v32 = vand.u32 2147483648, %v1233_v29  ;;  %vm1238_vm6 = vcmp.eq.f32.partialorder %v1233_v29, 0.0 }
 0x342   :  { %v1583_v30 = vpop.eup %1582 }
 0x343   :  { %v1235_v31 = vmul.f32 %v1583_v30, %v1233_v29 }
 0x345   :  { %v1237_v33 = vsel %vm1236_vm5, %v1233_v29, %v1235_v31 }
 0x346   :  { %v1240_v34 = vsel %vm1238_vm6, %v1239_v32, %v1237_v33 }
 0x347   :  { %v1241_v35 = vmax.f32 %v1240_v34, 1e-12 }
 0x349   :  { %1584 = vrcp.f32 %v1241_v35 }
 0x356   :  { %v1585_v39 = vpop.eup %1584 }
 0x357   :  { %v1243_v41 = vmul.f32 %v1585_v39, %v1226_v36 }
 0x359   :  { %v1245_v45 = vrot.slane %v1243_v41, 6 }
 0x35b   :  { %v1247_v46 = vsel %vm1230_vm4, %v1131_v42, %v1245_v45 }
 0x35c   :  { %v1249_v47 = vsel %vm1248_vm7, %v1247_v46, 0.0 }
 0x35d   :  { %1250 = vst [vmem:[%s2095_s6] sm:$0xff] %v1249_v47 }

</bundles_post_ra>
